<compile_context>
chip_gen: v5e
topology: v5e:2x2
jax: 0.10.0
libtpu: 0.0.40
codegen_flags: <defaults>
</compile_context>

<pallas_src>
from functools import partial

import jax
import jax.numpy as jnp
from jax.experimental import pallas as pl
from jax.experimental.pallas import tpu as pltpu


LANE = 128


def _round_up(x, m):
    return (x + m - 1) // m * m


# ----------------------------- Pallas kernel --------------------------------

def _gcn_stack_kernel(a_ref, x_ref, w_ref, b_ref, o_ref, h_ref):
    """One grid step == one GCNConv layer.

    a_ref : (Np, Np)   bf16  normalized adjacency, resident across the grid
    x_ref : (Np, Dp)   f32   input features, resident (read only at layer 0)
    w_ref : (1, Dp, Dp) bf16 this layer's (zero-padded) weight
    b_ref : (1, 1, Dp)  f32  this layer's (zero-padded) bias
    o_ref : (Np, Dp)   f32   output block (revisited; last layer's value lands)
    h_ref : (Np, Dp)   f32   VMEM scratch carrying the activation across layers
    """
    layer = pl.program_id(0)

    @pl.when(layer == 0)
    def _():
        h_ref[...] = x_ref[...]

    # X @ W on the MXU (bf16 inputs, f32 accumulation).
    xw = jnp.dot(h_ref[...].astype(jnp.bfloat16), w_ref[0],
                 preferred_element_type=jnp.float32)
    # Neighbour aggregation: A_hat @ (X W), again bf16 -> f32 on the MXU.
    out = jnp.dot(a_ref[...], xw.astype(jnp.bfloat16),
                  preferred_element_type=jnp.float32)
    out = out + b_ref[0]                      # bias broadcast over nodes (f32)

    # The revisited output block is flushed to HBM after the last grid step,
    # so writing every step leaves exactly the final layer's (no-ReLU) value.
    o_ref[...] = out.astype(o_ref.dtype)
    # ReLU'd activation carried to the next layer (harmless on the last step).
    h_ref[...] = jnp.maximum(out, 0.0)
    # TODO(synk): training-mode dropout (Bernoulli mask + 1/(1-p) scaling) is
    # not implemented; F.dropout(training=False) is the identity in eval mode.


def gcn_stack(a_hat_pad, x_pad, w_stack, b_stack):
    """Fused forward over all GCNConv layers in a single pallas_call."""
    n_pad, d_pad = x_pad.shape
    num_layers_total = w_stack.shape[0]

    flops = int(2 * num_layers_total
                * (n_pad * d_pad * d_pad + n_pad * n_pad * d_pad))
    bytes_accessed = int(a_hat_pad.size * a_hat_pad.dtype.itemsize
                         + x_pad.size * 4
                         + w_stack.size * w_stack.dtype.itemsize
                         + b_stack.size * 4
                         + n_pad * d_pad * 4)

    return pl.pallas_call(
        _gcn_stack_kernel,
        out_shape=jax.ShapeDtypeStruct((n_pad, d_pad), jnp.float32),
        grid_spec=pltpu.PrefetchScalarGridSpec(
            num_scalar_prefetch=0,
            grid=(num_layers_total,),
            in_specs=[
                # A_hat: same block index every step -> DMA'd once, resident.
                pl.BlockSpec((n_pad, n_pad), lambda l: (0, 0)),
                # X: same block index every step -> DMA'd once.
                pl.BlockSpec((n_pad, d_pad), lambda l: (0, 0)),
                # Per-layer weight / bias: pipelined along the layer axis.
                pl.BlockSpec((1, d_pad, d_pad), lambda l: (l, 0, 0)),
                pl.BlockSpec((1, 1, d_pad), lambda l: (l, 0, 0)),
            ],
            out_specs=pl.BlockSpec((n_pad, d_pad), lambda l: (0, 0)),
            scratch_shapes=[pltpu.VMEM((n_pad, d_pad), jnp.float32)],
        ),
        compiler_params=pltpu.CompilerParams(
            dimension_semantics=("arbitrary",)),
        cost_estimate=pl.CostEstimate(
            flops=flops, transcendentals=0, bytes_accessed=bytes_accessed),
    )(a_hat_pad, x_pad, w_stack, b_stack)


# ------------------------------ JAX glue -------------------------------------

def gcn_norm_dense(edge_index, edge_weight, num_nodes, num_nodes_pad):
    """Dense symmetric-normalized adjacency, PyG gcn_norm semantics
    (add_self_loops=True, fill_value=1).  deg / rsqrt are computed in f32; the
    dense matrix is cast to bf16 only at the end (the kernel accumulates in
    f32 via preferred_element_type)."""
    src, dst = edge_index[0], edge_index[1]
    loop = jnp.arange(num_nodes, dtype=edge_index.dtype)
    src = jnp.concatenate([src, loop])
    dst = jnp.concatenate([dst, loop])
    w = jnp.concatenate(
        [edge_weight.astype(jnp.float32),
         jnp.ones((num_nodes,), jnp.float32)])
    deg = jnp.zeros((num_nodes,), jnp.float32).at[dst].add(w)
    dinv = jnp.where(deg > 0, jax.lax.rsqrt(deg), 0.0)
    norm = dinv[src] * w * dinv[dst]
    a_hat = jnp.zeros((num_nodes_pad, num_nodes_pad),
                      jnp.float32).at[dst, src].add(norm)
    return a_hat.astype(jnp.bfloat16)


def init_gcn_params(key, input_size, output_size, hidden_layer_size, num_layers):
    """Glorot-uniform weights + zero bias, same shapes as the PyTorch module:
    num_layers hidden GCNConvs + one final GCNConv."""
    dims = [input_size] + [hidden_layer_size] * num_layers + [output_size]
    params = []
    for din, dout in zip(dims[:-1], dims[1:]):
        key, sub = jax.random.split(key)
        bound = jnp.sqrt(6.0 / (din + dout))
        w = jax.random.uniform(sub, (din, dout), jnp.float32, -bound, bound)
        b = jnp.zeros((dout,), jnp.float32)
        params.append((w, b))
    return params


def _pack_params(params, d_pad):
    """Zero-pad every (W, b) to (d_pad, d_pad) / (1, d_pad) and stack along a
    leading layer axis so the kernel streams one layer's weights per grid step.
    Zero padding keeps the math exact: padded input columns only ever multiply
    zero weight rows."""
    ws, bs = [], []
    for w, b in params:
        din, dout = w.shape
        wp = jnp.zeros((d_pad, d_pad), jnp.float32).at[:din, :dout].set(w)
        bp = jnp.zeros((1, d_pad), jnp.float32).at[0, :dout].set(b)
        ws.append(wp)
        bs.append(bp)
    w_stack = jnp.stack(ws).astype(jnp.bfloat16)     # (L, d_pad, d_pad)
    b_stack = jnp.stack(bs)                          # (L, 1, d_pad), f32
    return w_stack, b_stack


def gcn_forward(params, x, edge_index, edge_weight, drop_prob=0.5):
    """GCN.forward (inference): [GCNConv -> ReLU -> dropout]* -> GCNConv."""
    n, din = x.shape
    dout = params[-1][0].shape[1]
    d_pad = _round_up(max([din] + [w.shape[1] for w, _ in params]), LANE)
    n_pad = _round_up(n, LANE)

    a_hat = gcn_norm_dense(edge_index, edge_weight, n, n_pad)
    x_pad = jnp.zeros((n_pad, d_pad), jnp.float32).at[:n, :din].set(x)
    w_stack, b_stack = _pack_params(params, d_pad)

    out_pad = gcn_stack(a_hat, x_pad, w_stack, b_stack)
    return out_pad[:n, :dout]


# ------------------------------- main ----------------------------------------

if __name__ == "__main__":
    key = jax.random.PRNGKey(0)

    num_nodes = 64
    num_edges = 128
    input_size = 16
    hidden_layer_size = 32
    output_size = 8
    num_layers = 2
    drop_prob = 0.5

    k_x, k_src, k_dst, k_w, k_p = jax.random.split(key, 5)
    x = jax.random.normal(k_x, (num_nodes, input_size), jnp.float32)
    edge_index = jnp.stack([
        jax.random.randint(k_src, (num_edges,), 0, num_nodes, jnp.int32),
        jax.random.randint(k_dst, (num_edges,), 0, num_nodes, jnp.int32),
    ])
    edge_weight = jax.random.uniform(
        k_w, (num_edges,), jnp.float32, 0.1, 1.0)

    params = init_gcn_params(
        k_p, input_size, output_size, hidden_layer_size, num_layers)

    out = gcn_forward(params, x, edge_index, edge_weight, drop_prob)
    out = jax.block_until_ready(out)
    assert out.shape == (num_nodes, output_size)
    assert jnp.all(jnp.isfinite(out))
    print("KERNEL_OK")
</pallas_src>

<mosaic_0001>
module attributes {stable_mosaic.version = 11 : i64} {
  func.func @_gcn_stack_kernel(%arg0: i32, %arg1: memref<128x128xbf16, #tpu.memory_space<vmem>>, %arg2: memref<128x128xf32, #tpu.memory_space<vmem>>, %arg3: memref<1x128x128xbf16, #tpu.memory_space<vmem>>, %arg4: memref<1x1x128xf32, #tpu.memory_space<vmem>>, %arg5: memref<128x128xf32, #tpu.memory_space<vmem>>, %arg6: memref<128x128xf32, #tpu.memory_space<vmem>>) attributes {dimension_semantics = [#tpu.dimension_semantics<arbitrary>], iteration_bounds = array<i64: 3>, scalar_prefetch = 0 : i64, scratch_operands = 1 : i64, tpu.core_type = #tpu.core_type<tc>, window_params = [{pipeline_mode = #tpu.pipeline_mode<synchronous>, transform_indices = @transform_0, window_bounds = array<i64: 128, 128>}, {pipeline_mode = #tpu.pipeline_mode<synchronous>, transform_indices = @transform_1, window_bounds = array<i64: 128, 128>}, {transform_indices = @transform_2, window_bounds = array<i64: 1, 128, 128>}, {transform_indices = @transform_3, window_bounds = array<i64: 1, 1, 128>}, {pipeline_mode = #tpu.pipeline_mode<synchronous>, transform_indices = @transform_4, window_bounds = array<i64: 128, 128>}]} {
    %c0_i32 = arith.constant 0 : i32
    %0 = arith.cmpi eq, %arg0, %c0_i32 : i32
    %1 = arith.extui %0 : i1 to i32
    %c0_i32_0 = arith.constant 0 : i32
    %2 = arith.cmpi ne, %1, %c0_i32_0 : i32
    scf.if %2 {
      %c0_16 = arith.constant 0 : index
      %c0_17 = arith.constant 0 : index
      %19 = vector.load %arg2[%c0_16, %c0_17] : memref<128x128xf32, #tpu.memory_space<vmem>>, vector<128x128xf32>
      %c0_18 = arith.constant 0 : index
      %c0_19 = arith.constant 0 : index
      %20 = vector.load %arg6[%c0_18, %c0_19] : memref<128x128xf32, #tpu.memory_space<vmem>>, vector<128x128xf32>
      tpu.vector_store %arg6[%c0_18, %c0_19], %19 {strides = array<i32>} : memref<128x128xf32, #tpu.memory_space<vmem>>, vector<128x128xf32>,
    } else {
    }
    %c0 = arith.constant 0 : index
    %c0_1 = arith.constant 0 : index
    %3 = vector.load %arg6[%c0, %c0_1] : memref<128x128xf32, #tpu.memory_space<vmem>>, vector<128x128xf32>
    %4 = arith.truncf %3 : vector<128x128xf32> to vector<128x128xbf16>
    %c0_2 = arith.constant 0 : index
    %c0_3 = arith.constant 0 : index
    %c0_4 = arith.constant 0 : index
    %5 = vector.load %arg3[%c0_2, %c0_3, %c0_4] : memref<1x128x128xbf16, #tpu.memory_space<vmem>>, vector<1x128x128xbf16>
    %6 = vector.shape_cast %5 : vector<1x128x128xbf16> to vector<128x128xbf16>
    %cst = arith.constant dense<0.000000e+00> : vector<128x128xf32>
    %7 = tpu.matmul %4, %6, %cst {dimension_numbers = #tpu.dot_dimension_numbers<[1], [0], [0], [1], [0, 0, 1, 1], [], []>} : vector<128x128xbf16>, vector<128x128xbf16>, vector<128x128xf32> -> vector<128x128xf32>
    %c0_5 = arith.constant 0 : index
    %c0_6 = arith.constant 0 : index
    %8 = vector.load %arg1[%c0_5, %c0_6] : memref<128x128xbf16, #tpu.memory_space<vmem>>, vector<128x128xbf16>
    %9 = arith.truncf %7 : vector<128x128xf32> to vector<128x128xbf16>
    %cst_7 = arith.constant dense<0.000000e+00> : vector<128x128xf32>
    %10 = tpu.matmul %8, %9, %cst_7 {dimension_numbers = #tpu.dot_dimension_numbers<[1], [0], [0], [1], [0, 0, 1, 1], [], []>} : vector<128x128xbf16>, vector<128x128xbf16>, vector<128x128xf32> -> vector<128x128xf32>
    %c0_8 = arith.constant 0 : index
    %c0_9 = arith.constant 0 : index
    %c0_10 = arith.constant 0 : index
    %11 = vector.load %arg4[%c0_8, %c0_9, %c0_10] : memref<1x1x128xf32, #tpu.memory_space<vmem>>, vector<1x1x128xf32>
    %12 = vector.shape_cast %11 : vector<1x1x128xf32> to vector<1x128xf32>
    %13 = vector.broadcast %12 : vector<1x128xf32> to vector<128x128xf32>
    %14 = arith.addf %10, %13 : vector<128x128xf32>
    %c0_11 = arith.constant 0 : index
    %c0_12 = arith.constant 0 : index
    %15 = vector.load %arg5[%c0_11, %c0_12] : memref<128x128xf32, #tpu.memory_space<vmem>>, vector<128x128xf32>
    tpu.vector_store %arg5[%c0_11, %c0_12], %14 {strides = array<i32>} : memref<128x128xf32, #tpu.memory_space<vmem>>, vector<128x128xf32>,
    %cst_13 = arith.constant 0.000000e+00 : f32
    %16 = vector.broadcast %cst_13 : f32 to vector<128x128xf32>
    %17 = arith.maximumf %14, %16 : vector<128x128xf32>
    %c0_14 = arith.constant 0 : index
    %c0_15 = arith.constant 0 : index
    %18 = vector.load %arg6[%c0_14, %c0_15] : memref<128x128xf32, #tpu.memory_space<vmem>>, vector<128x128xf32>
    tpu.vector_store %arg6[%c0_14, %c0_15], %17 {strides = array<i32>} : memref<128x128xf32, #tpu.memory_space<vmem>>, vector<128x128xf32>,
    return
  }
  func.func @transform_0(%arg0: i32) -> (i32, i32) {
    %c0_i32 = arith.constant 0 : i32
    %c0_i32_0 = arith.constant 0 : i32
    %c0_i32_1 = arith.constant 0 : i32
    return %c0_i32, %c0_i32_0 : i32, i32
  }
  func.func @transform_1(%arg0: i32) -> (i32, i32) {
    %c0_i32 = arith.constant 0 : i32
    %c0_i32_0 = arith.constant 0 : i32
    %c0_i32_1 = arith.constant 0 : i32
    return %c0_i32, %c0_i32_0 : i32, i32
  }
  func.func @transform_2(%arg0: i32) -> (i32, i32, i32) {
    %c0_i32 = arith.constant 0 : i32
    %c0_i32_0 = arith.constant 0 : i32
    %c0_i32_1 = arith.constant 0 : i32
    return %arg0, %c0_i32, %c0_i32_0 : i32, i32, i32
  }
  func.func @transform_3(%arg0: i32) -> (i32, i32, i32) {
    %c0_i32 = arith.constant 0 : i32
    %c0_i32_0 = arith.constant 0 : i32
    %c0_i32_1 = arith.constant 0 : i32
    return %arg0, %c0_i32, %c0_i32_0 : i32, i32, i32
  }
  func.func @transform_4(%arg0: i32) -> (i32, i32) {
    %c0_i32 = arith.constant 0 : i32
    %c0_i32_0 = arith.constant 0 : i32
    %c0_i32_1 = arith.constant 0 : i32
    return %c0_i32, %c0_i32_0 : i32, i32
  }
}

</mosaic_0001>

<bundles_post_ra>
// kernel: tpu_custom_call.1
= control target key start
LH: loop header
LB: loop body
LE: loop exit
PB: predicated region body
PF: predicated region fallthrough
CT: control target
= control target key end

     0   :  { %s1321_s0 = inlined_call_operand.hbm [shape: bf16[128,128], index: 0, kind: input, shape index: {}]   ;;  %s1322_s1 = inlined_call_operand.hbm [shape: f32[128,128], index: 1, kind: input, shape index: {}]   ;;  %s1323_s2 = inlined_call_operand.hbm [shape: bf16[3,128,128], index: 2, kind: input, shape index: {}]   ;;  %s1324_s3 = inlined_call_operand.hbm [shape: f32[3,1,128], index: 3, kind: input, shape index: {}]   ;;  %s1325_s4 = inlined_call_operand.hbm [shape: f32[128,128], index: 4, kind: output, shape index: {}]  }
   0x1   :  { %1327 = sst [smem:[#allocation15_spill]] %s1321_s0 }
   0x2   :  { %1328 = sst [smem:[#allocation16_spill]] %s1322_s1 }
   0x3   :  { %9 = vsyncpa [#allocation4], 0 }
   0x4   :  { %10 = vsyncpa [#allocation7], 0 }
   0x5   :  { %11 = vsyncpa [#allocation5], 0  ;;  %s1134_s15 = smov 0   ;;  %s1136_s16 = smov 0  }
   0x6   :  { %s1138_s17 = smov 0   ;;  %s1140_s18 = smov 0  }
   0x7 LB: > { %s1153_s19 = sadd.s32 4294967295, %s1098_s18   ;;  %p79_p0 = scmp.ne.s32.totalorder %s1090_s16, %s1086_s15  ;;  %s1098_s18 = sphi %s1140_s18, %s1339_s18   ;;  %s1094_s17 = sphi %s1138_s17, %s1338_s17   ;;  %s1090_s16 = sphi %s1136_s16, %s1337_s16   ;;  %s1086_s15 = sphi %s1134_s15, %s1336_s15  }
   0x8   : > { %p80_p1 = scmp.eq.s32.totalorder %s1153_s19, 0  ;;  %p712_p2 = scmp.ge.s32.totalorder %s1098_s18, 1 }
   0x9   : > { %p137_p3 = scmp.lt.s32.totalorder %s1098_s18, 4  ;;  %p713_p4 = scmp.ne.s32.totalorder %s1153_s19, 0 }
   0xa   : > { %p1162_p5 = por %p80_p1, %p79_p0  ;;  %s1330_s0 = sld [smem:[#allocation15_spill]] }
   0xb   : > { %p1169_p6 = pnand %p712_p2, %p137_p3  ;;  %s1100_s25 = smov [#allocation3]  }
   0xc   : > { %s150_s26 = sshll.u32 %s1100_s25, 4  ;;  %s1182_s28 = sadd.s32 1, %s1098_s18   ;;  %s151_s26 = int_to_ptr.vmem [resolvable:$true] %s150_s26 }
   0xd   : > { %p841_p7 = pneg %p1169_p6  ;;  %s1101_s29 = smov 64  }
   0xe   : > { %s1102_s30 = smov 4   ;;  %s63_s5 = ssub.s32 %s1098_s18, %s1182_s28 }
   0xf   : > { %p1177_p8 = pnand %p841_p7, %p80_p1  ;;  %s66_s6 = sadd.s32 1, %s1094_s17 }
  0x10   : > { %s148_s23 = sshll.u32 %s1330_s0, 4  ;;  %p64_p9 = scmp.eq.s32.totalorder %s63_s5, 0  ;;  %s149_s23 = int_to_ptr.hbm [resolvable:$true] %s148_s23 }
  0x11   : > { %844 = dma.hbm_to_vmem [thread:$0]  (!%p1177_p8), %s149_s23, 1024, %s151_s26, [#allocation4], %s1101_s29, %s1101_s29, %s1102_s30  }
  0x12   : > { %p73_p10 = scmp.ne.s32.totalorder %s1094_s17, %s1090_s16  ;;  %p74_p11 = scmp.eq.s32.totalorder %s1098_s18, 0 }
  0x13   : > { %p857_p12 = scmp.lt.s32.totalorder %s1098_s18, 3  ;;  %s178_s8 = sand.u32 1, %s1098_s18  }
  0x14   : > { %s1197_s7 = scalar_select %p64_p9, %s1094_s17, %s66_s6  }
  0x15   : > { %p75_p13 = por %p74_p11, %p73_p10  ;;  %s1326_s9 = sand.u32 1, %s1094_s17  }
  0x16   : > { %s716_s10 = sshll.u32 %s1326_s9, 6  ;;  %s792_s11 = sshll.u32 %s1098_s18, 6 }
  0x17   : > { %s187_s14 = scalar_lea.hbm %s1323_s2, %s792_s11  ;;  %s182_s21 = scalar_lea.vmem [#allocation8], %s716_s10 }
  0x18   : > { %s188_s15 = sshll.u32 %s187_s14, 4  ;;  %s190_s22 = sshll.u32 %s182_s21, 4  ;;  %s189_s15 = int_to_ptr.hbm [resolvable:$true] %s188_s15  ;;  %s191_s22 = int_to_ptr.vmem [resolvable:$true] %s190_s22 }
  0x19   : > { %p1209_p0 = pnand %p857_p12, %p75_p13  ;;  %s1334_s1 = sld [smem:[#allocation16_spill]] }
  0x1a   : > { %s1103_s6 = smov [#allocation6]   ;;  %s1216_s11 = scalar_lea.sflag [#allocation4], %s178_s8 }
  0x1b   : > { %s164_s12 = sshll.u32 %s1103_s6, 4  ;;  %s934_s10 = sshra.s32 %s189_s15, 4  ;;  %s935_s10 = int_to_ptr.hbm [resolvable:$true] %s934_s10  ;;  %s165_s12 = int_to_ptr.vmem [resolvable:$true] %s164_s12 }
  0x1c   : > { %s936_s13 = scalar_lea.hbm %s935_s10, 64  ;;  %p938_p3 = pneg %p1209_p0 }
  0x1d   : > { %p937_p2 = scmp.ne.s32.totalorder %s935_s10, %s936_s13  ;;  %s941_s25 = scalar_lea.hbm %s1323_s2, 192 }
  0x1e   : > { %p942_p10 = scmp.lt.s32.totalorder %s935_s10, %s1323_s2  ;;  %p943_p11 = scmp.lt.s32.totalorder %s941_s25, %s936_s13 }
  0x1f   : > { %s162_s5 = sshll.u32 %s1334_s1, 4  ;;  %p939_p7 = pnand %p938_p3, %p937_p2  ;;  %s163_s5 = int_to_ptr.hbm [resolvable:$true] %s162_s5 }
  0x20   : > { %p944_p12 = por %p943_p11, %p942_p10 }
  0x21   : > { %p940_p9 = pneg %p939_p7 }
  0x23   : > { %p945_p13 = pnand %p944_p12, %p940_p9 }
  0x25   : > { %948 = shalt.err (!%p945_p13)
}
  0x26   : > { %851 = dma.hbm_to_vmem [thread:$0]  (!%p1209_p0), %s189_s15, 1024, %s191_s22, %s1216_s11, %s1101_s29, %s1101_s29, %s1102_s30  }
  0x27   : > { %s1104_s8 = smov 128   ;;  %s1105_s6 = smov 8  }
  0x28   : > { %847 = dma.hbm_to_vmem [thread:$0]  (!%p1177_p8), %s163_s5, 2048, %s165_s12, [#allocation7], %s1104_s8, %s1104_s8, %s1105_s6  }
  0x29   : > { %s206_s13 = scalar_lea.hbm %s1324_s3, %s1098_s18  ;;  %s1335_s14 = sand.u32 1, %s1094_s17  }
  0x2a   : > { %s203_s21 = scalar_lea.vmem [#allocation9], %s1335_s14  ;;  %s208_s26 = sshll.u32 %s206_s13, 4  ;;  %s209_s26 = int_to_ptr.hbm [resolvable:$true] %s208_s26 }
  0x2b   : > { %s210_s25 = sshll.u32 %s203_s21, 4  ;;  %s994_s0 = sshra.s32 %s209_s26, 4  ;;  %s211_s25 = int_to_ptr.vmem [resolvable:$true] %s210_s25  ;;  %s995_s0 = int_to_ptr.hbm [resolvable:$true] %s994_s0 }
  0x2c   : > { %s996_s1 = scalar_lea.hbm %s995_s0, 1  ;;  %s1001_s30 = scalar_lea.hbm %s1324_s3, 3 }
  0x2d   : > { %p997_p2 = scmp.ne.s32.totalorder %s995_s0, %s996_s1  ;;  %p1002_p8 = scmp.lt.s32.totalorder %s995_s0, %s1324_s3 }
  0x2e   : > { %p1003_p10 = scmp.lt.s32.totalorder %s1001_s30, %s996_s1 }
  0x2f   : > { %p999_p7 = pnand %p997_p2, %p938_p3 }
  0x30   : > { %p1004_p11 = por %p1003_p10, %p1002_p8 }
  0x31   : > { %p1000_p9 = pneg %p999_p7 }
  0x33   : > { %p1005_p12 = pnand %p1004_p11, %p1000_p9 }
  0x35   : > { %1008 = shalt.err (!%p1005_p12)
}
  0x36   : > { %854 = dma.hbm_to_vmem [thread:$0]  (!%p1209_p0), %s209_s26, 16, %s211_s25, %s1216_s11  }
  0x37   : > { %219 = sbr.rel (%p1169_p6) target bundleno = 537 (0x219), region = 36 }
  0x3c   : > { %1069 = dma.done.wait (%p80_p1), [#allocation4], 1024  }
  0x3d   : > { %1071 = vsyncadd (%p80_p1), [#allocation4], 4294966272 }
  0x3e   : > { %1073 = dma.done.wait (%p80_p1), [#allocation7], 2048  }
  0x3f   : > { %1075 = vsyncadd (%p80_p1), [#allocation7], 4294965248  ;;  %s231_s0 = sand.u32 1, %s1153_s19   ;;  %s233_s1 = sand.u32 1, %s1090_s16  }
  0x40   : > { %s722_s22 = sshll.u32 %s233_s1, 6  ;;  %s232_s24 = scalar_lea.sflag [#allocation4], %s231_s0 }
  0x41   : > { %s1267_s23 = scalar_lea.vmem [#allocation8], %s722_s22 }
  0x42   : > { %1077 = dma.done.wait (%p1162_p5), %s232_s24, 1040  }
  0x43   : > { %1079 = vsyncadd (%p1162_p5), %s232_s24, 4294966256  ;;  %s1273_s5 = scalar_lea.vmem [#allocation9], %s233_s1  ;;  %272 = sbr.rel (%p713_p4) target bundleno = 89 (0x59), region = 56 }
  0x48   : > { %v273_v0 = vld [vmem:[#allocation6] sm:$0xff]  ;;  %v274_v1 = vld [vmem:[#allocation6 + $0x8] sm:$0xff]  ;;  %v275_v2 = vld [vmem:[#allocation6 + $0x10] sm:$0xff] }
  0x49   : > { %289 = vst [vmem:[#allocation2 + $0x30] sm:$0xff] %v273_v0  ;;  %v276_v3 = vld [vmem:[#allocation6 + $0x18] sm:$0xff]  ;;  %v277_v4 = vld [vmem:[#allocation6 + $0x20] sm:$0xff]  ;;  %v278_v5 = vld [vmem:[#allocation6 + $0x28] sm:$0xff] }
  0x4a   : > { %290 = vst [vmem:[#allocation2] sm:$0xff] %v274_v1  ;;  %v279_v6 = vld [vmem:[#allocation6 + $0x30] sm:$0xff]  ;;  %v280_v7 = vld [vmem:[#allocation6 + $0x38] sm:$0xff]  ;;  %v281_v8 = vld [vmem:[#allocation6 + $0x40] sm:$0xff] }
  0x4b   : > { %291 = vst [vmem:[#allocation2 + $0x58] sm:$0xff] %v275_v2  ;;  %v282_v9 = vld [vmem:[#allocation6 + $0x48] sm:$0xff]  ;;  %v283_v10 = vld [vmem:[#allocation6 + $0x50] sm:$0xff]  ;;  %v284_v11 = vld [vmem:[#allocation6 + $0x58] sm:$0xff] }
  0x4c   : > { %292 = vst [vmem:[#allocation2 + $0x18] sm:$0xff] %v276_v3  ;;  %v285_v12 = vld [vmem:[#allocation6 + $0x60] sm:$0xff]  ;;  %v286_v13 = vld [vmem:[#allocation6 + $0x68] sm:$0xff]  ;;  %v287_v14 = vld [vmem:[#allocation6 + $0x70] sm:$0xff] }
  0x4d   : > { %293 = vst [vmem:[#allocation2 + $0x50] sm:$0xff] %v277_v4  ;;  %v288_v15 = vld [vmem:[#allocation6 + $0x78] sm:$0xff] }
  0x4e   : > { %294 = vst [vmem:[#allocation2 + $0x68] sm:$0xff] %v278_v5 }
  0x4f   : > { %295 = vst [vmem:[#allocation2 + $0x8] sm:$0xff] %v279_v6 }
  0x50   : > { %296 = vst [vmem:[#allocation2 + $0x48] sm:$0xff] %v280_v7 }
  0x51   : > { %297 = vst [vmem:[#allocation2 + $0x40] sm:$0xff] %v281_v8 }
  0x52   : > { %298 = vst [vmem:[#allocation2 + $0x20] sm:$0xff] %v282_v9 }
  0x53   : > { %299 = vst [vmem:[#allocation2 + $0x10] sm:$0xff] %v283_v10 }
  0x54   : > { %300 = vst [vmem:[#allocation2 + $0x38] sm:$0xff] %v284_v11 }
  0x55   : > { %301 = vst [vmem:[#allocation2 + $0x60] sm:$0xff] %v285_v12 }
  0x56   : > { %302 = vst [vmem:[#allocation2 + $0x70] sm:$0xff] %v286_v13 }
  0x57   : > { %303 = vst [vmem:[#allocation2 + $0x78] sm:$0xff] %v287_v14 }
  0x58   : > { %304 = vst [vmem:[#allocation2 + $0x28] sm:$0xff] %v288_v15 }
  0x59 PF: > { %v800_v16 = vld [vmem:[%s1267_s23 + $0x38] sm:$0xff]  ;;  %v799_v17 = vld [vmem:[%s1267_s23 + $0x30] sm:$0xff]  ;;  %v798_v18 = vld [vmem:[%s1267_s23 + $0x28] sm:$0xff]  ;;  %s1106_s20 = smov [#allocation10]   ;;  %s622_s6 = sshll.u32 %s1325_s4, 4  ;;  %s623_s6 = int_to_ptr.hbm [resolvable:$true] %s622_s6 }
  0x5a   : > { %809 = vmatpush.bf16.msra.mxu2 %v800_v16  ;;  %393 = vmatpush.bf16.msra.mxu0 %v800_v16  ;;  %v797_v19 = vld [vmem:[%s1267_s23 + $0x20] sm:$0xff]  ;;  %v796_v20 = vld [vmem:[%s1267_s23 + $0x18] sm:$0xff]  ;;  %v795_v21 = vld [vmem:[%s1267_s23 + $0x10] sm:$0xff]  ;;  %s620_s12 = sshll.u32 %s1106_s20, 4  ;;  %p860_p1 = scmp.eq.s32.totalorder %s1153_s19, 2  ;;  %s621_s12 = int_to_ptr.vmem [resolvable:$true] %s620_s12 }
  0x5b   : > { %v794_v22 = vld [vmem:[%s1267_s23 + $0x8] sm:$0xff]  ;;  %v793_v23 = vld [vmem:[%s1267_s23] sm:$0xff]  ;;  %v305_v26 = vld [vmem:[#allocation2 + $0x30] sm:$0xff]  ;;  %s1107_s9 = smov 128   ;;  %s1108_s10 = smov 8  }
  0x5c   : > { %v313_v24 = vld [vmem:[#allocation2 + $0x40] sm:$0xff]  ;;  %v315_v30 = vld [vmem:[#allocation2 + $0x10] sm:$0xff]  ;;  %v316_v31 = vld [vmem:[#allocation2 + $0x38] sm:$0xff] }
  0x5d   : > { %v314_v25 = vld [vmem:[#allocation2 + $0x20] sm:$0xff]  ;;  %v307_v32 = vld [vmem:[#allocation2 + $0x58] sm:$0xff]  ;;  %v326_v34 = vpack.c.bf16 %v316_v31, %v315_v30  ;;  %v318_v37 = vld [vmem:[#allocation2 + $0x70] sm:$0xff] }
  0x5e   : > { %810 = vmatpush.bf16.msra.mxu2 %v799_v17  ;;  %394 = vmatpush.bf16.msra.mxu0 %v799_v17  ;;  %v306_v27 = vld [vmem:[#allocation2] sm:$0xff]  ;;  %v325_v28 = vpack.c.bf16 %v314_v25, %v313_v24  ;;  %v308_v33 = vld [vmem:[#allocation2 + $0x18] sm:$0xff]  ;;  %v309_v38 = vld [vmem:[#allocation2 + $0x50] sm:$0xff] }
  0x5f   : > { %v321_v29 = vpack.c.bf16 %v306_v27, %v305_v26  ;;  %v322_v35 = vpack.c.bf16 %v308_v33, %v307_v32  ;;  %v317_v36 = vld [vmem:[#allocation2 + $0x60] sm:$0xff]  ;;  %v310_v39 = vld [vmem:[#allocation2 + $0x68] sm:$0xff]  ;;  %v319_v42 = vld [vmem:[#allocation2 + $0x78] sm:$0xff] }
  0x60   : > { %v327_v40 = vpack.c.bf16 %v318_v37, %v317_v36  ;;  %v323_v41 = vpack.c.bf16 %v310_v39, %v309_v38  ;;  %v320_v43 = vld [vmem:[#allocation2 + $0x28] sm:$0xff]  ;;  %v801_v8 = vld [vmem:[#allocation3] sm:$0xff]  ;;  %v803_v12 = vld [vmem:[#allocation3 + $0x10] sm:$0xff] }
  0x61   : > { %v311_v44 = vld [vmem:[#allocation2 + $0x8] sm:$0xff]  ;;  %v328_v46 = vpack.c.bf16 %v320_v43, %v319_v42  ;;  %v805_v9 = vld [vmem:[#allocation3 + $0x20] sm:$0xff]  ;;  %v807_v13 = vld [vmem:[#allocation3 + $0x30] sm:$0xff] }
  0x62   : > { %811 = vmatpush.bf16.msra.mxu2 %v798_v18  ;;  %395 = vmatpush.bf16.msra.mxu0 %v798_v18  ;;  %v312_v45 = vld [vmem:[#allocation2 + $0x48] sm:$0xff]  ;;  %v804_v14 = vld [vmem:[#allocation3 + $0x18] sm:$0xff]  ;;  %v1286_v16 = vld [vmem:[%s1273_s5] ss:$0 sm:$0xff] }
  0x63   : > { %v324_v47 = vpack.c.bf16 %v312_v45, %v311_v44  ;;  %v802_v10 = vld [vmem:[#allocation3 + $0x8] sm:$0xff]  ;;  %v808_v15 = vld [vmem:[#allocation3 + $0x38] sm:$0xff] }
  0x64   : > { %v806_v11 = vld [vmem:[#allocation3 + $0x28] sm:$0xff] }
  0x66   : > { %812 = vmatpush.bf16.msra.mxu2 %v797_v19  ;;  %396 = vmatpush.bf16.msra.mxu0 %v797_v19 }
  0x6a   : > { %813 = vmatpush.bf16.msra.mxu2 %v796_v20  ;;  %397 = vmatpush.bf16.msra.mxu0 %v796_v20 }
  0x6e   : > { %814 = vmatpush.bf16.msra.mxu2 %v795_v21  ;;  %398 = vmatpush.bf16.msra.mxu0 %v795_v21 }
  0x72   : > { %815 = vmatpush.bf16.msra.mxu2 %v794_v22  ;;  %399 = vmatpush.bf16.msra.mxu0 %v794_v22 }
  0x76   : > { %816 = vmatpush.bf16.msra.mxu2 %v793_v23  ;;  %400 = vmatpush.bf16.msra.mxu0 %v793_v23 }
  0x79   : > { %421 = vmatmul.bf16.vlgmr.msra.gmra.mxu2 %v325_v28  ;;  %401 = vmatmul.bf16.vlgmr.msra.gmra.mxu0 %v321_v29 }
  0x89   : > { %426 = vmatmul.bf16.gmra.mxu2 %v326_v34  ;;  %406 = vmatmul.bf16.gmra.mxu0 %v322_v35 }
  0x99   : > { %431 = vmatmul.bf16.gmra.mxu2 %v327_v40  ;;  %411 = vmatmul.bf16.gmra.mxu0 %v323_v41 }
  0xa9   : > { %436 = vmatmul.bf16.gmra.mxu2 %v328_v46  ;;  %416 = vmatmul.bf16.gmra.mxu0 %v324_v47 }
  0xf6   : > { %v402_v49 = vpop.f32.mrf.mxu0 }
  0xfc   : > { %v422_v48 = vpop.f32.mrf.mxu2 }
  0xfe   : > { %v404_v51 = vpop.f32.mrf.mxu0 }
  0xff   : > { %v458_v7 = vpack.c.bf16 %v404_v51, %v402_v49 }
 0x104   : > { %v424_v50 = vpop.f32.mrf.mxu2 }
 0x105   : > { %v462_v2 = vpack.c.bf16 %v424_v50, %v422_v48 }
 0x106   : > { %v407_v53 = vpop.f32.mrf.mxu0 }
 0x10c   : > { %v427_v52 = vpop.f32.mrf.mxu2 }
 0x10e   : > { %v409_v55 = vpop.f32.mrf.mxu0 }
 0x10f   : > { %v459_v6 = vpack.c.bf16 %v409_v55, %v407_v53 }
 0x114   : > { %v429_v54 = vpop.f32.mrf.mxu2 }
 0x115   : > { %v463_v1 = vpack.c.bf16 %v429_v54, %v427_v52 }
 0x116   : > { %v412_v57 = vpop.f32.mrf.mxu0 }
 0x11c   : > { %v432_v56 = vpop.f32.mrf.mxu2 }
 0x11e   : > { %v414_v60 = vpop.f32.mrf.mxu0 }
 0x11f   : > { %v460_v5 = vpack.c.bf16 %v414_v60, %v412_v57 }
 0x124   : > { %v434_v58 = vpop.f32.mrf.mxu2 }
 0x125   : > { %v464_v0 = vpack.c.bf16 %v434_v58, %v432_v56 }
 0x126   : > { %v417_v63 = vpop.f32.mrf.mxu0 }
 0x12c   : > { %v437_v59 = vpop.f32.mrf.mxu2 }
 0x12e   : > { %v419_v3 = vpop.f32.mrf.mxu0 }
 0x12f   : > { %v461_v4 = vpack.c.bf16 %v419_v3, %v417_v63 }
 0x134   : > { %v439_v61 = vpop.f32.mrf.mxu2 }
 0x135   : > { %v465_v62 = vpack.c.bf16 %v439_v61, %v437_v59 }
 0x137   : > { %518 = vmatpush.bf16.msra.mxu1 %v465_v62  ;;  %817 = vmatpush.bf16.msra.mxu3 %v465_v62 }
 0x13b   : > { %519 = vmatpush.bf16.msra.mxu1 %v464_v0  ;;  %818 = vmatpush.bf16.msra.mxu3 %v464_v0 }
 0x13f   : > { %520 = vmatpush.bf16.msra.mxu1 %v463_v1  ;;  %819 = vmatpush.bf16.msra.mxu3 %v463_v1 }
 0x143   : > { %521 = vmatpush.bf16.msra.mxu1 %v462_v2  ;;  %820 = vmatpush.bf16.msra.mxu3 %v462_v2 }
 0x147   : > { %522 = vmatpush.bf16.msra.mxu1 %v461_v4  ;;  %821 = vmatpush.bf16.msra.mxu3 %v461_v4 }
 0x14b   : > { %523 = vmatpush.bf16.msra.mxu1 %v460_v5  ;;  %822 = vmatpush.bf16.msra.mxu3 %v460_v5 }
 0x14f   : > { %524 = vmatpush.bf16.msra.mxu1 %v459_v6  ;;  %823 = vmatpush.bf16.msra.mxu3 %v459_v6 }
 0x153   : > { %525 = vmatpush.bf16.msra.mxu1 %v458_v7  ;;  %824 = vmatpush.bf16.msra.mxu3 %v458_v7 }
 0x156   : > { %526 = vmatmul.bf16.vlgmr.msra.gmra.mxu1 %v801_v8  ;;  %546 = vmatmul.bf16.vlgmr.msra.gmra.mxu3 %v805_v9 }
 0x166   : > { %531 = vmatmul.bf16.gmra.mxu1 %v802_v10  ;;  %551 = vmatmul.bf16.gmra.mxu3 %v806_v11 }
 0x176   : > { %536 = vmatmul.bf16.gmra.mxu1 %v803_v12  ;;  %556 = vmatmul.bf16.gmra.mxu3 %v807_v13 }
 0x186   : > { %541 = vmatmul.bf16.gmra.mxu1 %v804_v14  ;;  %561 = vmatmul.bf16.gmra.mxu3 %v808_v15 }
 0x1d3   : > { %v527_v17 = vpop.f32.mrf.mxu1 }
 0x1d4   : > { %v528_v18 = vadd.f32 %v1286_v16, %v527_v17 }
 0x1d6   : > { %567 = vst [vmem:[#allocation10] sm:$0xff] %v528_v18  ;;  %v583_v19 = vmax.f32 %v528_v18, 0.0 }
 0x1d8   : > { %599 = vst [vmem:[#allocation2 + $0x30] sm:$0xff] %v583_v19 }
 0x1d9   : > { %v547_v20 = vpop.f32.mrf.mxu3 }
 0x1da   : > { %v548_v21 = vadd.f32 %v1286_v16, %v547_v20 }
 0x1db   : > { %v529_v22 = vpop.f32.mrf.mxu1 }
 0x1dc   : > { %575 = vst [vmem:[#allocation10 + $0x40] sm:$0xff] %v548_v21  ;;  %v591_v23 = vmax.f32 %v548_v21, 0.0  ;;  %v530_v24 = vadd.f32 %v1286_v16, %v529_v22 }
 0x1de   : > { %607 = vst [vmem:[#allocation2 + $0x40] sm:$0xff] %v591_v23  ;;  %v584_v25 = vmax.f32 %v530_v24, 0.0 }
 0x1df   : > { %568 = vst [vmem:[#allocation10 + $0x8] sm:$0xff] %v530_v24 }
 0x1e0   : > { %600 = vst [vmem:[#allocation2] sm:$0xff] %v584_v25 }
 0x1e1   : > { %v549_v26 = vpop.f32.mrf.mxu3 }
 0x1e2   : > { %v550_v27 = vadd.f32 %v1286_v16, %v549_v26 }
 0x1e3   : > { %v532_v28 = vpop.f32.mrf.mxu1 }
 0x1e4   : > { %576 = vst [vmem:[#allocation10 + $0x48] sm:$0xff] %v550_v27  ;;  %v592_v29 = vmax.f32 %v550_v27, 0.0  ;;  %v533_v30 = vadd.f32 %v1286_v16, %v532_v28 }
 0x1e6   : > { %608 = vst [vmem:[#allocation2 + $0x20] sm:$0xff] %v592_v29  ;;  %v585_v31 = vmax.f32 %v533_v30, 0.0 }
 0x1e7   : > { %569 = vst [vmem:[#allocation10 + $0x10] sm:$0xff] %v533_v30 }
 0x1e8   : > { %601 = vst [vmem:[#allocation2 + $0x58] sm:$0xff] %v585_v31 }
 0x1e9   : > { %v552_v32 = vpop.f32.mrf.mxu3 }
 0x1ea   : > { %v553_v33 = vadd.f32 %v1286_v16, %v552_v32 }
 0x1eb   : > { %v534_v34 = vpop.f32.mrf.mxu1 }
 0x1ec   : > { %577 = vst [vmem:[#allocation10 + $0x50] sm:$0xff] %v553_v33  ;;  %v593_v35 = vmax.f32 %v553_v33, 0.0  ;;  %v535_v36 = vadd.f32 %v1286_v16, %v534_v34 }
 0x1ee   : > { %609 = vst [vmem:[#allocation2 + $0x10] sm:$0xff] %v593_v35  ;;  %v586_v37 = vmax.f32 %v535_v36, 0.0 }
 0x1ef   : > { %570 = vst [vmem:[#allocation10 + $0x18] sm:$0xff] %v535_v36 }
 0x1f0   : > { %602 = vst [vmem:[#allocation2 + $0x18] sm:$0xff] %v586_v37 }
 0x1f1   : > { %v554_v38 = vpop.f32.mrf.mxu3 }
 0x1f2   : > { %v555_v39 = vadd.f32 %v1286_v16, %v554_v38 }
 0x1f3   : > { %v537_v40 = vpop.f32.mrf.mxu1 }
 0x1f4   : > { %578 = vst [vmem:[#allocation10 + $0x58] sm:$0xff] %v555_v39  ;;  %v594_v41 = vmax.f32 %v555_v39, 0.0  ;;  %v538_v42 = vadd.f32 %v1286_v16, %v537_v40 }
 0x1f6   : > { %610 = vst [vmem:[#allocation2 + $0x38] sm:$0xff] %v594_v41  ;;  %v587_v43 = vmax.f32 %v538_v42, 0.0 }
 0x1f7   : > { %571 = vst [vmem:[#allocation10 + $0x20] sm:$0xff] %v538_v42 }
 0x1f8   : > { %603 = vst [vmem:[#allocation2 + $0x50] sm:$0xff] %v587_v43 }
 0x1f9   : > { %v557_v44 = vpop.f32.mrf.mxu3 }
 0x1fa   : > { %v558_v45 = vadd.f32 %v1286_v16, %v557_v44 }
 0x1fb   : > { %v539_v46 = vpop.f32.mrf.mxu1 }
 0x1fc   : > { %579 = vst [vmem:[#allocation10 + $0x60] sm:$0xff] %v558_v45  ;;  %v595_v47 = vmax.f32 %v558_v45, 0.0  ;;  %v540_v48 = vadd.f32 %v1286_v16, %v539_v46 }
 0x1fe   : > { %611 = vst [vmem:[#allocation2 + $0x60] sm:$0xff] %v595_v47  ;;  %v588_v49 = vmax.f32 %v540_v48, 0.0 }
 0x1ff   : > { %572 = vst [vmem:[#allocation10 + $0x28] sm:$0xff] %v540_v48 }
 0x200   : > { %604 = vst [vmem:[#allocation2 + $0x68] sm:$0xff] %v588_v49 }
 0x201   : > { %v559_v50 = vpop.f32.mrf.mxu3 }
 0x202   : > { %v560_v51 = vadd.f32 %v1286_v16, %v559_v50 }
 0x203   : > { %v542_v52 = vpop.f32.mrf.mxu1 }
 0x204   : > { %580 = vst [vmem:[#allocation10 + $0x68] sm:$0xff] %v560_v51  ;;  %v596_v53 = vmax.f32 %v560_v51, 0.0  ;;  %v543_v54 = vadd.f32 %v1286_v16, %v542_v52 }
 0x206   : > { %612 = vst [vmem:[#allocation2 + $0x70] sm:$0xff] %v596_v53  ;;  %v589_v55 = vmax.f32 %v543_v54, 0.0 }
 0x207   : > { %573 = vst [vmem:[#allocation10 + $0x30] sm:$0xff] %v543_v54 }
 0x208   : > { %605 = vst [vmem:[#allocation2 + $0x8] sm:$0xff] %v589_v55 }
 0x209   : > { %v562_v56 = vpop.f32.mrf.mxu3 }
 0x20a   : > { %v563_v57 = vadd.f32 %v1286_v16, %v562_v56 }
 0x20b   : > { %v544_v58 = vpop.f32.mrf.mxu1 }
 0x20c   : > { %581 = vst [vmem:[#allocation10 + $0x70] sm:$0xff] %v563_v57  ;;  %v597_v59 = vmax.f32 %v563_v57, 0.0  ;;  %v545_v60 = vadd.f32 %v1286_v16, %v544_v58 }
 0x20e   : > { %613 = vst [vmem:[#allocation2 + $0x78] sm:$0xff] %v597_v59  ;;  %v590_v61 = vmax.f32 %v545_v60, 0.0 }
 0x20f   : > { %574 = vst [vmem:[#allocation10 + $0x38] sm:$0xff] %v545_v60 }
 0x210   : > { %606 = vst [vmem:[#allocation2 + $0x48] sm:$0xff] %v590_v61 }
 0x211   : > { %v564_v62 = vpop.f32.mrf.mxu3 }
 0x212   : > { %v565_v63 = vadd.f32 %v1286_v16, %v564_v62 }
 0x214   : > { %582 = vst [vmem:[#allocation10 + $0x78] sm:$0xff] %v565_v63  ;;  %v598_v0 = vmax.f32 %v565_v63, 0.0 }
 0x215   : > { %838 = dma.vmem_to_hbm [thread:$0]  (%p860_p1), %s621_s12, 2048, %s623_s6, [#allocation5], %s1107_s9, %s1107_s9, %s1108_s10  }
 0x216   : > { %614 = vst [vmem:[#allocation2 + $0x28] sm:$0xff] %v598_v0 }
 0x217   : > { %1081 = dma.done.wait (%p860_p1), [#allocation5], 2048  }
 0x218   : > { %1083 = vsyncadd (%p860_p1), [#allocation5], 4294965248 }
 0x219 PF: > { %p14_p4 = scmp.ge.s32.totalorder %s1182_s28, 5   ;;  %s1336_s15 = smov %s1090_s16 }
 0x21a   : > { %s1337_s16 = smov %s1094_s17  ;;  %s1338_s17 = smov %s1197_s7 }
 0x21b   : > { %s1339_s18 = smov %s1182_s28  ;;  %16 = sbr.rel (!%p14_p4) target bundleno = 7 (0x7), region = 95 }
 0x220   :  { %639 = vsyncpa [#allocation4], 1 }
 0x221   :  { %641 = vsyncpa [#allocation4 + $0x1], 1 }
 0x222   :  { %642 = vsyncpa [#allocation7], 1 }
 0x223   :  { %643 = vsyncpa [#allocation5], 1 }
 0x224   :  { %645 = vsyncpa [#allocation5 + $0x1], 1 }

</bundles_post_ra>
